<compile_context>
chip_gen: v7x
topology: tpu7x:2x2x1
jax: 0.10.0
libtpu: 0.0.40
codegen_flags: <defaults>
</compile_context>

<pallas_src>
import jax
import jax.numpy as jnp
from jax import lax
from jax.experimental import pallas as pl
from jax.experimental.pallas import tpu as pltpu


# ----------------------------- small helpers --------------------------------

def _round_up(x, m):
    return ((x + m - 1) // m) * m


def _vmem_capacity_bytes():
    """Physical VMEM per TensorCore (generation-aware, with a safe fallback)."""
    try:
        return int(pltpu.get_tpu_info().vmem_capacity_bytes)
    except Exception:
        return 64 << 20          # v7x per-TC VMEM — smallest in the fleet


def _chunk_vmem_bytes(TT, B, H, L, Op):
    """Chunk-resident VMEM: gx/hs/h/c scratch + double-buffered x / out blocks."""
    f32 = 4
    scratch = (TT * B * (4 * H + H) + 2 * B * H) * f32
    io = 2 * TT * B * (L + Op) * f32
    return scratch + io


def _weight_vmem_bytes(prep):
    # x2 for the default double buffering of (grid-invariant) weight inputs.
    return 2 * sum(int(a.size) * a.dtype.itemsize for a in prep.values())


def _pick_chunk(T, B, H, L, Op, weight_bytes, cap=64):
    """Largest time-chunk <= cap whose resident footprint fits half of VMEM."""
    budget = _vmem_capacity_bytes() // 2
    TT = max(1, min(cap, T))
    while TT > 8 and _chunk_vmem_bytes(TT, B, H, L, Op) + weight_bytes > budget:
        TT = (TT + 1) // 2
    return TT


# ------------------------------- the kernel ---------------------------------

def _lstm_chunk_kernel(x_ref, wih_ref, whh_ref, b_ref, wfc_ref, bfc_ref,
                       out_ref, h_sc, c_sc, gx_sc, hs_sc):
    """One grid step == one chunk of TT LSTM time steps (time-major layout).

    x_ref   : (TT, B, L)      time-major input chunk (f32)
    wih_ref : (L, 4H)         gate-reordered (i,f,o,g), transposed W_ih (mm dtype)
    whh_ref : (H, 4H)         gate-reordered, transposed W_hh (mm dtype)
    b_ref   : (1, 4H)         gate-reordered bias_ih + bias_hh (f32)
    wfc_ref : (H, Op)         transposed fc weight, O padded to 128 lanes
    bfc_ref : (1, Op)         padded fc bias (f32)
    out_ref : (TT, B, Op)     time-major, lane-dense output chunk
    h_sc,c_sc : (B, H)        recurrent state (persists across chunks)
    gx_sc   : (TT, B, 4H)     chunk input projection (f32)
    hs_sc   : (TT, B, H)      chunk hidden-state history (f32)
    """
    TT, B, L = x_ref.shape
    H = h_sc.shape[1]
    mm_dtype = whh_ref.dtype          # bf16 (fast path) or f32 (checking path)

    @pl.when(pl.program_id(0) == 0)
    def _():
        h_sc[...] = jnp.zeros_like(h_sc)
        c_sc[...] = jnp.zeros_like(c_sc)

    # --- Phase 1: input projection + bias for the whole chunk (one matmul) ---
    # The (TT,B,L)->(TT*B,L) merge is a once-per-chunk relayout at worst; it is
    # kept out of the serial per-step loop.
    x2 = x_ref[...].astype(mm_dtype).reshape(TT * B, L)
    gx = jnp.dot(x2, wih_ref[...], preferred_element_type=jnp.float32) + b_ref[...]
    gx_sc[...] = gx.reshape(TT, B, 4 * H)

    # --- Phase 2: serial recurrence (fori_loop, partial unroll) --------------
    def step(t, carry):
        h, c = carry
        gates = gx_sc[t] + jnp.dot(h.astype(mm_dtype), whh_ref[...],
                                   preferred_element_type=jnp.float32)  # (B, 4H)
        sig = jax.nn.sigmoid(gates[:, :3 * H])      # (i, f, o) in one EUP slab
        i_g = sig[:, 0 * H:1 * H]
        f_g = sig[:, 1 * H:2 * H]
        o_g = sig[:, 2 * H:3 * H]
        g_g = jnp.tanh(gates[:, 3 * H:])
        c = f_g * c + i_g * g_g
        h = o_g * jnp.tanh(c)
        hs_sc[t] = h                                # (B, H) store, leading index
        return h, c

    h, c = lax.fori_loop(0, TT, step, (h_sc[...], c_sc[...]),
                         unroll=min(TT, 8))
    h_sc[...] = h
    c_sc[...] = c

    # --- Phase 3: fc + tanh head for the whole chunk (one matmul), lane-dense -
    hs2 = hs_sc[...].astype(wfc_ref.dtype).reshape(TT * B, H)
    y = jnp.dot(hs2, wfc_ref[...], preferred_element_type=jnp.float32) + bfc_ref[...]
    out_ref[...] = jnp.tanh(y).reshape(TT, B, out_ref.shape[-1]).astype(out_ref.dtype)


# ------------------------------- the wrapper ---------------------------------

def prepare_params(params, matmul_dtype=jnp.bfloat16):
    """ONE-TIME weight prep (hoisted out of the per-call path).

    * gates reordered from PyTorch (i, f, g, o) to (i, f, o, g)
    * transposed matmul layouts, MXU-operand dtype cast (bf16 by default)
    * fc output padded to a lane-dense 128-wide block; biases kept f32
    """
    w_ih, w_hh = params["w_ih"], params["w_hh"]
    b_ih, b_hh = params["b_ih"], params["b_hh"]
    w_fc, b_fc = params["w_fc"], params["b_fc"]
    O = w_fc.shape[0]
    Op = _round_up(O, 128)

    def reorder(w):                     # torch packs (i, f, g, o)
        i, f, g, o = jnp.split(w, 4, axis=0)
        return jnp.concatenate([i, f, o, g], axis=0)

    return {
        "wih": reorder(w_ih).T.astype(matmul_dtype),                        # (L, 4H)
        "whh": reorder(w_hh).T.astype(matmul_dtype),                        # (H, 4H)
        "b":   reorder(b_ih + b_hh).reshape(1, -1).astype(jnp.float32),     # (1, 4H)
        "wfc": jnp.pad(w_fc.T, ((0, 0), (0, Op - O))).astype(matmul_dtype), # (H, Op)
        "bfc": jnp.pad(b_fc, (0, Op - O)).reshape(1, Op).astype(jnp.float32),
    }


def lstm_g_forward(z, prep, o_dim):
    """z: (B, T, L) float32, batch-first (PyTorch convention). Returns (B, T, o_dim)."""
    B, T, L = z.shape
    wih, whh, b, wfc, bfc = prep["wih"], prep["whh"], prep["b"], prep["wfc"], prep["bfc"]
    H, G = whh.shape          # G == 4*H (packed gate width)
    Op = wfc.shape[1]
    assert G == 4 * H and wih.shape == (L, G)

    weight_bytes = _weight_vmem_bytes(prep)
    TT = _pick_chunk(T, B, H, L, Op, weight_bytes)
    Tp = _round_up(T, TT)
    n_chunks = Tp // TT

    # Only raise the scoped-VMEM limit if the estimate exceeds the default.
    est = _chunk_vmem_bytes(TT, B, H, L, Op) + weight_bytes
    vmem_limit = None
    if est > (32 << 20):
        vmem_limit = int(min(_round_up(est, 1 << 20) + (4 << 20),
                             int(_vmem_capacity_bytes() * 0.9)))

    # Time-major activations; pad the time axis to a whole number of chunks.
    # (Padded steps only influence discarded outputs / never-consumed state.)
    zt = jnp.transpose(z, (1, 0, 2))                      # (T, B, L)
    if Tp != T:
        zt = jnp.pad(zt, ((0, Tp - T), (0, 0), (0, 0)))

    out = pl.pallas_call(
        _lstm_chunk_kernel,
        out_shape=jax.ShapeDtypeStruct((Tp, B, Op), jnp.float32),
        grid_spec=pltpu.PrefetchScalarGridSpec(
            num_scalar_prefetch=0,
            grid=(n_chunks,),                              # sequential time chunks
            in_specs=[
                pl.BlockSpec((TT, B, L), lambda i: (i, 0, 0)),   # x chunk (time-major)
                pl.BlockSpec((L, G), lambda i: (0, 0)),          # W_ih^T   (grid-invariant)
                pl.BlockSpec((H, G), lambda i: (0, 0)),          # W_hh^T   (grid-invariant)
                pl.BlockSpec((1, G), lambda i: (0, 0)),          # gate bias
                pl.BlockSpec((H, Op), lambda i: (0, 0)),         # W_fc^T (lane-dense)
                pl.BlockSpec((1, Op), lambda i: (0, 0)),         # fc bias
            ],
            out_specs=pl.BlockSpec((TT, B, Op), lambda i: (i, 0, 0)),
            scratch_shapes=[
                pltpu.VMEM((B, H), jnp.float32),                 # h state
                pltpu.VMEM((B, H), jnp.float32),                 # c state
                pltpu.VMEM((TT, B, G), jnp.float32),             # Gx chunk
                pltpu.VMEM((TT, B, H), jnp.float32),             # h history chunk
            ],
        ),
        compiler_params=pltpu.CompilerParams(
            dimension_semantics=("arbitrary",),                  # serial recurrence
            vmem_limit_bytes=vmem_limit,
        ),
    )(zt, wih, whh, b, wfc, bfc)

    # Back to batch-first; drop the time padding and the output lane padding.
    return jnp.transpose(out, (1, 0, 2))[:, :T, :o_dim]


# --------------------------- reference & params ------------------------------

def lstm_g_reference(z, params):
    """Pure-JAX reference matching PyTorch nn.LSTM(batch_first) + Linear + tanh."""
    w_ih, w_hh = params["w_ih"], params["w_hh"]
    b = params["b_ih"] + params["b_hh"]
    w_fc, b_fc = params["w_fc"], params["b_fc"]
    B, T, L = z.shape
    H = w_hh.shape[1]

    def step(carry, x_t):
        h, c = carry
        gates = x_t @ w_ih.T + h @ w_hh.T + b
        i = jax.nn.sigmoid(gates[:, 0 * H:1 * H])
        f = jax.nn.sigmoid(gates[:, 1 * H:2 * H])
        g = jnp.tanh(gates[:, 2 * H:3 * H])
        o = jax.nn.sigmoid(gates[:, 3 * H:4 * H])
        c = f * c + i * g
        h = o * jnp.tanh(c)
        return (h, c), h

    h0 = jnp.zeros((B, H), jnp.float32)
    c0 = jnp.zeros((B, H), jnp.float32)
    _, hs = lax.scan(step, (h0, c0), jnp.transpose(z, (1, 0, 2)))
    o = jnp.transpose(hs, (1, 0, 2)) @ w_fc.T + b_fc
    return jnp.tanh(o)


def init_params(key, ldim, hdim, odim):
    """Deterministic init matching PyTorch parameter shapes / gate packing."""
    ks = jax.random.split(key, 6)
    s = 1.0 / jnp.sqrt(hdim)
    return {
        "w_ih": jax.random.uniform(ks[0], (4 * hdim, ldim), jnp.float32, -s, s),
        "w_hh": jax.random.uniform(ks[1], (4 * hdim, hdim), jnp.float32, -s, s),
        "b_ih": jax.random.uniform(ks[2], (4 * hdim,), jnp.float32, -s, s),
        "b_hh": jax.random.uniform(ks[3], (4 * hdim,), jnp.float32, -s, s),
        "w_fc": jax.random.uniform(ks[4], (odim, hdim), jnp.float32, -s, s),
        "b_fc": jax.random.uniform(ks[5], (odim,), jnp.float32, -s, s),
    }


if __name__ == "__main__":
    B, T, LDIM, HDIM, ODIM = 2, 8, 16, 32, 4

    key = jax.random.PRNGKey(0)
    k_p, k_x = jax.random.split(key)
    params = init_params(k_p, LDIM, HDIM, ODIM)
    z = jax.random.normal(k_x, (B, T, LDIM), jnp.float32)

    ref = lstm_g_reference(z, params)
    fwd = jax.jit(lstm_g_forward, static_argnames=("o_dim",))

    # f32 MXU operands: tight-tolerance correctness check.
    prep_f32 = prepare_params(params, matmul_dtype=jnp.float32)
    out_f32 = jax.block_until_ready(fwd(z, prep_f32, o_dim=ODIM))
    assert out_f32.shape == (B, T, ODIM)
    assert jnp.allclose(out_f32, ref, atol=1e-5, rtol=1e-5), (
        f"f32 max abs err {jnp.max(jnp.abs(out_f32 - ref))}")

    # bf16 MXU operands (f32 accumulation): the fast path.  The recurrence
    # compounds bf16 rounding over T steps, so the tolerance is looser.
    prep_bf16 = prepare_params(params, matmul_dtype=jnp.bfloat16)
    out_bf16 = jax.block_until_ready(fwd(z, prep_bf16, o_dim=ODIM))
    assert out_bf16.shape == (B, T, ODIM)
    assert jnp.allclose(out_bf16, ref, atol=1e-1, rtol=0.0), (
        f"bf16 max abs err {jnp.max(jnp.abs(out_bf16 - ref))}")

    print("KERNEL_OK")
</pallas_src>

<mosaic_0001>
module attributes {stable_mosaic.version = 11 : i64} {
  func.func @_lstm_chunk_kernel(%arg0: i32, %arg1: memref<8x2x16xf32, #tpu.memory_space<vmem>>, %arg2: memref<16x128xf32, #tpu.memory_space<vmem>>, %arg3: memref<32x128xf32, #tpu.memory_space<vmem>>, %arg4: memref<1x128xf32, #tpu.memory_space<vmem>>, %arg5: memref<32x128xf32, #tpu.memory_space<vmem>>, %arg6: memref<1x128xf32, #tpu.memory_space<vmem>>, %arg7: memref<8x2x128xf32, #tpu.memory_space<vmem>>, %arg8: memref<2x32xf32, #tpu.memory_space<vmem>>, %arg9: memref<2x32xf32, #tpu.memory_space<vmem>>, %arg10: memref<8x2x128xf32, #tpu.memory_space<vmem>>, %arg11: memref<8x2x32xf32, #tpu.memory_space<vmem>>) attributes {dimension_semantics = [#tpu.dimension_semantics<arbitrary>], iteration_bounds = array<i64: 1>, scalar_prefetch = 0 : i64, scratch_operands = 4 : i64, tpu.core_type = #tpu.core_type<tc>, window_params = [{transform_indices = @transform_0, window_bounds = array<i64: 8, 2, 16>}, {pipeline_mode = #tpu.pipeline_mode<synchronous>, transform_indices = @transform_1, window_bounds = array<i64: 16, 128>}, {pipeline_mode = #tpu.pipeline_mode<synchronous>, transform_indices = @transform_2, window_bounds = array<i64: 32, 128>}, {pipeline_mode = #tpu.pipeline_mode<synchronous>, transform_indices = @transform_3, window_bounds = array<i64: 1, 128>}, {pipeline_mode = #tpu.pipeline_mode<synchronous>, transform_indices = @transform_4, window_bounds = array<i64: 32, 128>}, {pipeline_mode = #tpu.pipeline_mode<synchronous>, transform_indices = @transform_5, window_bounds = array<i64: 1, 128>}, {transform_indices = @transform_6, window_bounds = array<i64: 8, 2, 128>}]} {
    %c0_i32 = arith.constant 0 : i32
    %0 = arith.cmpi eq, %arg0, %c0_i32 : i32
    %1 = arith.extui %0 : i1 to i32
    %c0_i32_0 = arith.constant 0 : i32
    %2 = arith.cmpi ne, %1, %c0_i32_0 : i32
    scf.if %2 {
      %cst_94 = arith.constant 0.000000e+00 : f32
      %234 = vector.broadcast %cst_94 : f32 to vector<2x32xf32>
      %c0_95 = arith.constant 0 : index
      %c0_96 = arith.constant 0 : index
      %235 = vector.load %arg8[%c0_95, %c0_96] : memref<2x32xf32, #tpu.memory_space<vmem>>, vector<2x32xf32>
      tpu.vector_store %arg8[%c0_95, %c0_96], %234 {strides = array<i32>} : memref<2x32xf32, #tpu.memory_space<vmem>>, vector<2x32xf32>,
      %cst_97 = arith.constant 0.000000e+00 : f32
      %236 = vector.broadcast %cst_97 : f32 to vector<2x32xf32>
      %c0_98 = arith.constant 0 : index
      %c0_99 = arith.constant 0 : index
      %237 = vector.load %arg9[%c0_98, %c0_99] : memref<2x32xf32, #tpu.memory_space<vmem>>, vector<2x32xf32>
      tpu.vector_store %arg9[%c0_98, %c0_99], %236 {strides = array<i32>} : memref<2x32xf32, #tpu.memory_space<vmem>>, vector<2x32xf32>,
    } else {
    }
    %c0 = arith.constant 0 : index
    %c0_1 = arith.constant 0 : index
    %c0_2 = arith.constant 0 : index
    %3 = vector.load %arg1[%c0, %c0_1, %c0_2] : memref<8x2x16xf32, #tpu.memory_space<vmem>>, vector<8x2x16xf32>
    %4 = vector.shape_cast %3 : vector<8x2x16xf32> to vector<16x16xf32>
    %c0_3 = arith.constant 0 : index
    %c0_4 = arith.constant 0 : index
    %5 = vector.load %arg2[%c0_3, %c0_4] : memref<16x128xf32, #tpu.memory_space<vmem>>, vector<16x128xf32>
    %cst = arith.constant dense<0.000000e+00> : vector<16x128xf32>
    %6 = tpu.matmul %4, %5, %cst {dimension_numbers = #tpu.dot_dimension_numbers<[1], [0], [0], [1], [0, 0, 1, 1], [], []>} : vector<16x16xf32>, vector<16x128xf32>, vector<16x128xf32> -> vector<16x128xf32>
    %c0_5 = arith.constant 0 : index
    %c0_6 = arith.constant 0 : index
    %7 = vector.load %arg4[%c0_5, %c0_6] : memref<1x128xf32, #tpu.memory_space<vmem>>, vector<1x128xf32>
    %8 = vector.broadcast %7 : vector<1x128xf32> to vector<16x128xf32>
    %9 = arith.addf %6, %8 : vector<16x128xf32>
    %10 = vector.shape_cast %9 : vector<16x128xf32> to vector<8x2x128xf32>
    %c0_7 = arith.constant 0 : index
    %c0_8 = arith.constant 0 : index
    %c0_9 = arith.constant 0 : index
    %11 = vector.load %arg10[%c0_7, %c0_8, %c0_9] : memref<8x2x128xf32, #tpu.memory_space<vmem>>, vector<8x2x128xf32>
    tpu.vector_store %arg10[%c0_7, %c0_8, %c0_9], %10 {strides = array<i32>} : memref<8x2x128xf32, #tpu.memory_space<vmem>>, vector<8x2x128xf32>,
    %c0_10 = arith.constant 0 : index
    %c0_11 = arith.constant 0 : index
    %12 = vector.load %arg8[%c0_10, %c0_11] : memref<2x32xf32, #tpu.memory_space<vmem>>, vector<2x32xf32>
    %c0_12 = arith.constant 0 : index
    %c0_13 = arith.constant 0 : index
    %13 = vector.load %arg9[%c0_12, %c0_13] : memref<2x32xf32, #tpu.memory_space<vmem>>, vector<2x32xf32>
    %c0_i32_14 = arith.constant 0 : i32
    %14 = arith.index_cast %c0_i32_14 : i32 to index
    %c0_15 = arith.constant 0 : index
    %c0_16 = arith.constant 0 : index
    %15 = vector.load %arg10[%14, %c0_15, %c0_16] : memref<8x2x128xf32, #tpu.memory_space<vmem>>, vector<1x2x128xf32>
    %16 = vector.shape_cast %15 : vector<1x2x128xf32> to vector<2x128xf32>
    %c0_17 = arith.constant 0 : index
    %c0_18 = arith.constant 0 : index
    %17 = vector.load %arg3[%c0_17, %c0_18] : memref<32x128xf32, #tpu.memory_space<vmem>>, vector<32x128xf32>
    %cst_19 = arith.constant dense<0.000000e+00> : vector<2x128xf32>
    %18 = tpu.matmul %12, %17, %cst_19 {dimension_numbers = #tpu.dot_dimension_numbers<[1], [0], [0], [1], [0, 0, 1, 1], [], []>} : vector<2x32xf32>, vector<32x128xf32>, vector<2x128xf32> -> vector<2x128xf32>
    %19 = arith.addf %16, %18 : vector<2x128xf32>
    %20 = vector.extract_strided_slice %19 {offsets = [0, 0], sizes = [2, 96], strides = [1, 1]} : vector<2x128xf32> to vector<2x96xf32>
    %21 = arith.negf %20 : vector<2x96xf32>
    %22 = math.exp %21 : vector<2x96xf32>
    %cst_20 = arith.constant 1.000000e+00 : f32
    %23 = vector.broadcast %cst_20 : f32 to vector<2x96xf32>
    %24 = arith.addf %23, %22 : vector<2x96xf32>
    %25 = arith.divf %23, %24 : vector<2x96xf32>
    %26 = vector.extract_strided_slice %25 {offsets = [0, 0], sizes = [2, 32], strides = [1, 1]} : vector<2x96xf32> to vector<2x32xf32>
    %27 = vector.extract_strided_slice %25 {offsets = [0, 32], sizes = [2, 32], strides = [1, 1]} : vector<2x96xf32> to vector<2x32xf32>
    %28 = vector.extract_strided_slice %25 {offsets = [0, 64], sizes = [2, 32], strides = [1, 1]} : vector<2x96xf32> to vector<2x32xf32>
    %29 = vector.extract_strided_slice %19 {offsets = [0, 96], sizes = [2, 32], strides = [1, 1]} : vector<2x128xf32> to vector<2x32xf32>
    %30 = math.tanh %29 : vector<2x32xf32>
    %31 = arith.mulf %27, %13 : vector<2x32xf32>
    %32 = arith.mulf %26, %30 : vector<2x32xf32>
    %33 = arith.addf %31, %32 : vector<2x32xf32>
    %34 = math.tanh %33 : vector<2x32xf32>
    %35 = arith.mulf %28, %34 : vector<2x32xf32>
    %36 = arith.index_cast %c0_i32_14 : i32 to index
    %c0_21 = arith.constant 0 : index
    %c0_22 = arith.constant 0 : index
    %37 = vector.load %arg11[%36, %c0_21, %c0_22] : memref<8x2x32xf32, #tpu.memory_space<vmem>>, vector<1x2x32xf32>
    %38 = vector.shape_cast %37 : vector<1x2x32xf32> to vector<2x32xf32>
    %39 = vector.shape_cast %35 : vector<2x32xf32> to vector<1x2x32xf32>
    tpu.vector_store %arg11[%36, %c0_21, %c0_22], %39 {strides = array<i32>} : memref<8x2x32xf32, #tpu.memory_space<vmem>>, vector<1x2x32xf32>,
    %c1_i32 = arith.constant 1 : i32
    %40 = arith.index_cast %c1_i32 : i32 to index
    %c0_23 = arith.constant 0 : index
    %c0_24 = arith.constant 0 : index
    %41 = vector.load %arg10[%40, %c0_23, %c0_24] : memref<8x2x128xf32, #tpu.memory_space<vmem>>, vector<1x2x128xf32>
    %42 = vector.shape_cast %41 : vector<1x2x128xf32> to vector<2x128xf32>
    %c0_25 = arith.constant 0 : index
    %c0_26 = arith.constant 0 : index
    %43 = vector.load %arg3[%c0_25, %c0_26] : memref<32x128xf32, #tpu.memory_space<vmem>>, vector<32x128xf32>
    %cst_27 = arith.constant dense<0.000000e+00> : vector<2x128xf32>
    %44 = tpu.matmul %35, %43, %cst_27 {dimension_numbers = #tpu.dot_dimension_numbers<[1], [0], [0], [1], [0, 0, 1, 1], [], []>} : vector<2x32xf32>, vector<32x128xf32>, vector<2x128xf32> -> vector<2x128xf32>
    %45 = arith.addf %42, %44 : vector<2x128xf32>
    %46 = vector.extract_strided_slice %45 {offsets = [0, 0], sizes = [2, 96], strides = [1, 1]} : vector<2x128xf32> to vector<2x96xf32>
    %47 = arith.negf %46 : vector<2x96xf32>
    %48 = math.exp %47 : vector<2x96xf32>
    %cst_28 = arith.constant 1.000000e+00 : f32
    %49 = vector.broadcast %cst_28 : f32 to vector<2x96xf32>
    %50 = arith.addf %49, %48 : vector<2x96xf32>
    %51 = arith.divf %49, %50 : vector<2x96xf32>
    %52 = vector.extract_strided_slice %51 {offsets = [0, 0], sizes = [2, 32], strides = [1, 1]} : vector<2x96xf32> to vector<2x32xf32>
    %53 = vector.extract_strided_slice %51 {offsets = [0, 32], sizes = [2, 32], strides = [1, 1]} : vector<2x96xf32> to vector<2x32xf32>
    %54 = vector.extract_strided_slice %51 {offsets = [0, 64], sizes = [2, 32], strides = [1, 1]} : vector<2x96xf32> to vector<2x32xf32>
    %55 = vector.extract_strided_slice %45 {offsets = [0, 96], sizes = [2, 32], strides = [1, 1]} : vector<2x128xf32> to vector<2x32xf32>
    %56 = math.tanh %55 : vector<2x32xf32>
    %57 = arith.mulf %53, %33 : vector<2x32xf32>
    %58 = arith.mulf %52, %56 : vector<2x32xf32>
    %59 = arith.addf %57, %58 : vector<2x32xf32>
    %60 = math.tanh %59 : vector<2x32xf32>
    %61 = arith.mulf %54, %60 : vector<2x32xf32>
    %62 = arith.index_cast %c1_i32 : i32 to index
    %c0_29 = arith.constant 0 : index
    %c0_30 = arith.constant 0 : index
    %63 = vector.load %arg11[%62, %c0_29, %c0_30] : memref<8x2x32xf32, #tpu.memory_space<vmem>>, vector<1x2x32xf32>
    %64 = vector.shape_cast %63 : vector<1x2x32xf32> to vector<2x32xf32>
    %65 = vector.shape_cast %61 : vector<2x32xf32> to vector<1x2x32xf32>
    tpu.vector_store %arg11[%62, %c0_29, %c0_30], %65 {strides = array<i32>} : memref<8x2x32xf32, #tpu.memory_space<vmem>>, vector<1x2x32xf32>,
    %c2_i32 = arith.constant 2 : i32
    %66 = arith.index_cast %c2_i32 : i32 to index
    %c0_31 = arith.constant 0 : index
    %c0_32 = arith.constant 0 : index
    %67 = vector.load %arg10[%66, %c0_31, %c0_32] : memref<8x2x128xf32, #tpu.memory_space<vmem>>, vector<1x2x128xf32>
    %68 = vector.shape_cast %67 : vector<1x2x128xf32> to vector<2x128xf32>
    %c0_33 = arith.constant 0 : index
    %c0_34 = arith.constant 0 : index
    %69 = vector.load %arg3[%c0_33, %c0_34] : memref<32x128xf32, #tpu.memory_space<vmem>>, vector<32x128xf32>
    %cst_35 = arith.constant dense<0.000000e+00> : vector<2x128xf32>
    %70 = tpu.matmul %61, %69, %cst_35 {dimension_numbers = #tpu.dot_dimension_numbers<[1], [0], [0], [1], [0, 0, 1, 1], [], []>} : vector<2x32xf32>, vector<32x128xf32>, vector<2x128xf32> -> vector<2x128xf32>
    %71 = arith.addf %68, %70 : vector<2x128xf32>
    %72 = vector.extract_strided_slice %71 {offsets = [0, 0], sizes = [2, 96], strides = [1, 1]} : vector<2x128xf32> to vector<2x96xf32>
    %73 = arith.negf %72 : vector<2x96xf32>
    %74 = math.exp %73 : vector<2x96xf32>
    %cst_36 = arith.constant 1.000000e+00 : f32
    %75 = vector.broadcast %cst_36 : f32 to vector<2x96xf32>
    %76 = arith.addf %75, %74 : vector<2x96xf32>
    %77 = arith.divf %75, %76 : vector<2x96xf32>
    %78 = vector.extract_strided_slice %77 {offsets = [0, 0], sizes = [2, 32], strides = [1, 1]} : vector<2x96xf32> to vector<2x32xf32>
    %79 = vector.extract_strided_slice %77 {offsets = [0, 32], sizes = [2, 32], strides = [1, 1]} : vector<2x96xf32> to vector<2x32xf32>
    %80 = vector.extract_strided_slice %77 {offsets = [0, 64], sizes = [2, 32], strides = [1, 1]} : vector<2x96xf32> to vector<2x32xf32>
    %81 = vector.extract_strided_slice %71 {offsets = [0, 96], sizes = [2, 32], strides = [1, 1]} : vector<2x128xf32> to vector<2x32xf32>
    %82 = math.tanh %81 : vector<2x32xf32>
    %83 = arith.mulf %79, %59 : vector<2x32xf32>
    %84 = arith.mulf %78, %82 : vector<2x32xf32>
    %85 = arith.addf %83, %84 : vector<2x32xf32>
    %86 = math.tanh %85 : vector<2x32xf32>
    %87 = arith.mulf %80, %86 : vector<2x32xf32>
    %88 = arith.index_cast %c2_i32 : i32 to index
    %c0_37 = arith.constant 0 : index
    %c0_38 = arith.constant 0 : index
    %89 = vector.load %arg11[%88, %c0_37, %c0_38] : memref<8x2x32xf32, #tpu.memory_space<vmem>>, vector<1x2x32xf32>
    %90 = vector.shape_cast %89 : vector<1x2x32xf32> to vector<2x32xf32>
    %91 = vector.shape_cast %87 : vector<2x32xf32> to vector<1x2x32xf32>
    tpu.vector_store %arg11[%88, %c0_37, %c0_38], %91 {strides = array<i32>} : memref<8x2x32xf32, #tpu.memory_space<vmem>>, vector<1x2x32xf32>,
    %c3_i32 = arith.constant 3 : i32
    %92 = arith.index_cast %c3_i32 : i32 to index
    %c0_39 = arith.constant 0 : index
    %c0_40 = arith.constant 0 : index
    %93 = vector.load %arg10[%92, %c0_39, %c0_40] : memref<8x2x128xf32, #tpu.memory_space<vmem>>, vector<1x2x128xf32>
    %94 = vector.shape_cast %93 : vector<1x2x128xf32> to vector<2x128xf32>
    %c0_41 = arith.constant 0 : index
    %c0_42 = arith.constant 0 : index
    %95 = vector.load %arg3[%c0_41, %c0_42] : memref<32x128xf32, #tpu.memory_space<vmem>>, vector<32x128xf32>
    %cst_43 = arith.constant dense<0.000000e+00> : vector<2x128xf32>
    %96 = tpu.matmul %87, %95, %cst_43 {dimension_numbers = #tpu.dot_dimension_numbers<[1], [0], [0], [1], [0, 0, 1, 1], [], []>} : vector<2x32xf32>, vector<32x128xf32>, vector<2x128xf32> -> vector<2x128xf32>
    %97 = arith.addf %94, %96 : vector<2x128xf32>
    %98 = vector.extract_strided_slice %97 {offsets = [0, 0], sizes = [2, 96], strides = [1, 1]} : vector<2x128xf32> to vector<2x96xf32>
    %99 = arith.negf %98 : vector<2x96xf32>
    %100 = math.exp %99 : vector<2x96xf32>
    %cst_44 = arith.constant 1.000000e+00 : f32
    %101 = vector.broadcast %cst_44 : f32 to vector<2x96xf32>
    %102 = arith.addf %101, %100 : vector<2x96xf32>
    %103 = arith.divf %101, %102 : vector<2x96xf32>
    %104 = vector.extract_strided_slice %103 {offsets = [0, 0], sizes = [2, 32], strides = [1, 1]} : vector<2x96xf32> to vector<2x32xf32>
    %105 = vector.extract_strided_slice %103 {offsets = [0, 32], sizes = [2, 32], strides = [1, 1]} : vector<2x96xf32> to vector<2x32xf32>
    %106 = vector.extract_strided_slice %103 {offsets = [0, 64], sizes = [2, 32], strides = [1, 1]} : vector<2x96xf32> to vector<2x32xf32>
    %107 = vector.extract_strided_slice %97 {offsets = [0, 96], sizes = [2, 32], strides = [1, 1]} : vector<2x128xf32> to vector<2x32xf32>
    %108 = math.tanh %107 : vector<2x32xf32>
    %109 = arith.mulf %105, %85 : vector<2x32xf32>
    %110 = arith.mulf %104, %108 : vector<2x32xf32>
    %111 = arith.addf %109, %110 : vector<2x32xf32>
    %112 = math.tanh %111 : vector<2x32xf32>
    %113 = arith.mulf %106, %112 : vector<2x32xf32>
    %114 = arith.index_cast %c3_i32 : i32 to index
    %c0_45 = arith.constant 0 : index
    %c0_46 = arith.constant 0 : index
    %115 = vector.load %arg11[%114, %c0_45, %c0_46] : memref<8x2x32xf32, #tpu.memory_space<vmem>>, vector<1x2x32xf32>
    %116 = vector.shape_cast %115 : vector<1x2x32xf32> to vector<2x32xf32>
    %117 = vector.shape_cast %113 : vector<2x32xf32> to vector<1x2x32xf32>
    tpu.vector_store %arg11[%114, %c0_45, %c0_46], %117 {strides = array<i32>} : memref<8x2x32xf32, #tpu.memory_space<vmem>>, vector<1x2x32xf32>,
    %c4_i32 = arith.constant 4 : i32
    %118 = arith.index_cast %c4_i32 : i32 to index
    %c0_47 = arith.constant 0 : index
    %c0_48 = arith.constant 0 : index
    %119 = vector.load %arg10[%118, %c0_47, %c0_48] : memref<8x2x128xf32, #tpu.memory_space<vmem>>, vector<1x2x128xf32>
    %120 = vector.shape_cast %119 : vector<1x2x128xf32> to vector<2x128xf32>
    %c0_49 = arith.constant 0 : index
    %c0_50 = arith.constant 0 : index
    %121 = vector.load %arg3[%c0_49, %c0_50] : memref<32x128xf32, #tpu.memory_space<vmem>>, vector<32x128xf32>
    %cst_51 = arith.constant dense<0.000000e+00> : vector<2x128xf32>
    %122 = tpu.matmul %113, %121, %cst_51 {dimension_numbers = #tpu.dot_dimension_numbers<[1], [0], [0], [1], [0, 0, 1, 1], [], []>} : vector<2x32xf32>, vector<32x128xf32>, vector<2x128xf32> -> vector<2x128xf32>
    %123 = arith.addf %120, %122 : vector<2x128xf32>
    %124 = vector.extract_strided_slice %123 {offsets = [0, 0], sizes = [2, 96], strides = [1, 1]} : vector<2x128xf32> to vector<2x96xf32>
    %125 = arith.negf %124 : vector<2x96xf32>
    %126 = math.exp %125 : vector<2x96xf32>
    %cst_52 = arith.constant 1.000000e+00 : f32
    %127 = vector.broadcast %cst_52 : f32 to vector<2x96xf32>
    %128 = arith.addf %127, %126 : vector<2x96xf32>
    %129 = arith.divf %127, %128 : vector<2x96xf32>
    %130 = vector.extract_strided_slice %129 {offsets = [0, 0], sizes = [2, 32], strides = [1, 1]} : vector<2x96xf32> to vector<2x32xf32>
    %131 = vector.extract_strided_slice %129 {offsets = [0, 32], sizes = [2, 32], strides = [1, 1]} : vector<2x96xf32> to vector<2x32xf32>
    %132 = vector.extract_strided_slice %129 {offsets = [0, 64], sizes = [2, 32], strides = [1, 1]} : vector<2x96xf32> to vector<2x32xf32>
    %133 = vector.extract_strided_slice %123 {offsets = [0, 96], sizes = [2, 32], strides = [1, 1]} : vector<2x128xf32> to vector<2x32xf32>
    %134 = math.tanh %133 : vector<2x32xf32>
    %135 = arith.mulf %131, %111 : vector<2x32xf32>
    %136 = arith.mulf %130, %134 : vector<2x32xf32>
    %137 = arith.addf %135, %136 : vector<2x32xf32>
    %138 = math.tanh %137 : vector<2x32xf32>
    %139 = arith.mulf %132, %138 : vector<2x32xf32>
    %140 = arith.index_cast %c4_i32 : i32 to index
    %c0_53 = arith.constant 0 : index
    %c0_54 = arith.constant 0 : index
    %141 = vector.load %arg11[%140, %c0_53, %c0_54] : memref<8x2x32xf32, #tpu.memory_space<vmem>>, vector<1x2x32xf32>
    %142 = vector.shape_cast %141 : vector<1x2x32xf32> to vector<2x32xf32>
    %143 = vector.shape_cast %139 : vector<2x32xf32> to vector<1x2x32xf32>
    tpu.vector_store %arg11[%140, %c0_53, %c0_54], %143 {strides = array<i32>} : memref<8x2x32xf32, #tpu.memory_space<vmem>>, vector<1x2x32xf32>,
    %c5_i32 = arith.constant 5 : i32
    %144 = arith.index_cast %c5_i32 : i32 to index
    %c0_55 = arith.constant 0 : index
    %c0_56 = arith.constant 0 : index
    %145 = vector.load %arg10[%144, %c0_55, %c0_56] : memref<8x2x128xf32, #tpu.memory_space<vmem>>, vector<1x2x128xf32>
    %146 = vector.shape_cast %145 : vector<1x2x128xf32> to vector<2x128xf32>
    %c0_57 = arith.constant 0 : index
    %c0_58 = arith.constant 0 : index
    %147 = vector.load %arg3[%c0_57, %c0_58] : memref<32x128xf32, #tpu.memory_space<vmem>>, vector<32x128xf32>
    %cst_59 = arith.constant dense<0.000000e+00> : vector<2x128xf32>
    %148 = tpu.matmul %139, %147, %cst_59 {dimension_numbers = #tpu.dot_dimension_numbers<[1], [0], [0], [1], [0, 0, 1, 1], [], []>} : vector<2x32xf32>, vector<32x128xf32>, vector<2x128xf32> -> vector<2x128xf32>
    %149 = arith.addf %146, %148 : vector<2x128xf32>
    %150 = vector.extract_strided_slice %149 {offsets = [0, 0], sizes = [2, 96], strides = [1, 1]} : vector<2x128xf32> to vector<2x96xf32>
    %151 = arith.negf %150 : vector<2x96xf32>
    %152 = math.exp %151 : vector<2x96xf32>
    %cst_60 = arith.constant 1.000000e+00 : f32
    %153 = vector.broadcast %cst_60 : f32 to vector<2x96xf32>
    %154 = arith.addf %153, %152 : vector<2x96xf32>
    %155 = arith.divf %153, %154 : vector<2x96xf32>
    %156 = vector.extract_strided_slice %155 {offsets = [0, 0], sizes = [2, 32], strides = [1, 1]} : vector<2x96xf32> to vector<2x32xf32>
    %157 = vector.extract_strided_slice %155 {offsets = [0, 32], sizes = [2, 32], strides = [1, 1]} : vector<2x96xf32> to vector<2x32xf32>
    %158 = vector.extract_strided_slice %155 {offsets = [0, 64], sizes = [2, 32], strides = [1, 1]} : vector<2x96xf32> to vector<2x32xf32>
    %159 = vector.extract_strided_slice %149 {offsets = [0, 96], sizes = [2, 32], strides = [1, 1]} : vector<2x128xf32> to vector<2x32xf32>
    %160 = math.tanh %159 : vector<2x32xf32>
    %161 = arith.mulf %157, %137 : vector<2x32xf32>
    %162 = arith.mulf %156, %160 : vector<2x32xf32>
    %163 = arith.addf %161, %162 : vector<2x32xf32>
    %164 = math.tanh %163 : vector<2x32xf32>
    %165 = arith.mulf %158, %164 : vector<2x32xf32>
    %166 = arith.index_cast %c5_i32 : i32 to index
    %c0_61 = arith.constant 0 : index
    %c0_62 = arith.constant 0 : index
    %167 = vector.load %arg11[%166, %c0_61, %c0_62] : memref<8x2x32xf32, #tpu.memory_space<vmem>>, vector<1x2x32xf32>
    %168 = vector.shape_cast %167 : vector<1x2x32xf32> to vector<2x32xf32>
    %169 = vector.shape_cast %165 : vector<2x32xf32> to vector<1x2x32xf32>
    tpu.vector_store %arg11[%166, %c0_61, %c0_62], %169 {strides = array<i32>} : memref<8x2x32xf32, #tpu.memory_space<vmem>>, vector<1x2x32xf32>,
    %c6_i32 = arith.constant 6 : i32
    %170 = arith.index_cast %c6_i32 : i32 to index
    %c0_63 = arith.constant 0 : index
    %c0_64 = arith.constant 0 : index
    %171 = vector.load %arg10[%170, %c0_63, %c0_64] : memref<8x2x128xf32, #tpu.memory_space<vmem>>, vector<1x2x128xf32>
    %172 = vector.shape_cast %171 : vector<1x2x128xf32> to vector<2x128xf32>
    %c0_65 = arith.constant 0 : index
    %c0_66 = arith.constant 0 : index
    %173 = vector.load %arg3[%c0_65, %c0_66] : memref<32x128xf32, #tpu.memory_space<vmem>>, vector<32x128xf32>
    %cst_67 = arith.constant dense<0.000000e+00> : vector<2x128xf32>
    %174 = tpu.matmul %165, %173, %cst_67 {dimension_numbers = #tpu.dot_dimension_numbers<[1], [0], [0], [1], [0, 0, 1, 1], [], []>} : vector<2x32xf32>, vector<32x128xf32>, vector<2x128xf32> -> vector<2x128xf32>
    %175 = arith.addf %172, %174 : vector<2x128xf32>
    %176 = vector.extract_strided_slice %175 {offsets = [0, 0], sizes = [2, 96], strides = [1, 1]} : vector<2x128xf32> to vector<2x96xf32>
    %177 = arith.negf %176 : vector<2x96xf32>
    %178 = math.exp %177 : vector<2x96xf32>
    %cst_68 = arith.constant 1.000000e+00 : f32
    %179 = vector.broadcast %cst_68 : f32 to vector<2x96xf32>
    %180 = arith.addf %179, %178 : vector<2x96xf32>
    %181 = arith.divf %179, %180 : vector<2x96xf32>
    %182 = vector.extract_strided_slice %181 {offsets = [0, 0], sizes = [2, 32], strides = [1, 1]} : vector<2x96xf32> to vector<2x32xf32>
    %183 = vector.extract_strided_slice %181 {offsets = [0, 32], sizes = [2, 32], strides = [1, 1]} : vector<2x96xf32> to vector<2x32xf32>
    %184 = vector.extract_strided_slice %181 {offsets = [0, 64], sizes = [2, 32], strides = [1, 1]} : vector<2x96xf32> to vector<2x32xf32>
    %185 = vector.extract_strided_slice %175 {offsets = [0, 96], sizes = [2, 32], strides = [1, 1]} : vector<2x128xf32> to vector<2x32xf32>
    %186 = math.tanh %185 : vector<2x32xf32>
    %187 = arith.mulf %183, %163 : vector<2x32xf32>
    %188 = arith.mulf %182, %186 : vector<2x32xf32>
    %189 = arith.addf %187, %188 : vector<2x32xf32>
    %190 = math.tanh %189 : vector<2x32xf32>
    %191 = arith.mulf %184, %190 : vector<2x32xf32>
    %192 = arith.index_cast %c6_i32 : i32 to index
    %c0_69 = arith.constant 0 : index
    %c0_70 = arith.constant 0 : index
    %193 = vector.load %arg11[%192, %c0_69, %c0_70] : memref<8x2x32xf32, #tpu.memory_space<vmem>>, vector<1x2x32xf32>
    %194 = vector.shape_cast %193 : vector<1x2x32xf32> to vector<2x32xf32>
    %195 = vector.shape_cast %191 : vector<2x32xf32> to vector<1x2x32xf32>
    tpu.vector_store %arg11[%192, %c0_69, %c0_70], %195 {strides = array<i32>} : memref<8x2x32xf32, #tpu.memory_space<vmem>>, vector<1x2x32xf32>,
    %c7_i32 = arith.constant 7 : i32
    %196 = arith.index_cast %c7_i32 : i32 to index
    %c0_71 = arith.constant 0 : index
    %c0_72 = arith.constant 0 : index
    %197 = vector.load %arg10[%196, %c0_71, %c0_72] : memref<8x2x128xf32, #tpu.memory_space<vmem>>, vector<1x2x128xf32>
    %198 = vector.shape_cast %197 : vector<1x2x128xf32> to vector<2x128xf32>
    %c0_73 = arith.constant 0 : index
    %c0_74 = arith.constant 0 : index
    %199 = vector.load %arg3[%c0_73, %c0_74] : memref<32x128xf32, #tpu.memory_space<vmem>>, vector<32x128xf32>
    %cst_75 = arith.constant dense<0.000000e+00> : vector<2x128xf32>
    %200 = tpu.matmul %191, %199, %cst_75 {dimension_numbers = #tpu.dot_dimension_numbers<[1], [0], [0], [1], [0, 0, 1, 1], [], []>} : vector<2x32xf32>, vector<32x128xf32>, vector<2x128xf32> -> vector<2x128xf32>
    %201 = arith.addf %198, %200 : vector<2x128xf32>
    %202 = vector.extract_strided_slice %201 {offsets = [0, 0], sizes = [2, 96], strides = [1, 1]} : vector<2x128xf32> to vector<2x96xf32>
    %203 = arith.negf %202 : vector<2x96xf32>
    %204 = math.exp %203 : vector<2x96xf32>
    %cst_76 = arith.constant 1.000000e+00 : f32
    %205 = vector.broadcast %cst_76 : f32 to vector<2x96xf32>
    %206 = arith.addf %205, %204 : vector<2x96xf32>
    %207 = arith.divf %205, %206 : vector<2x96xf32>
    %208 = vector.extract_strided_slice %207 {offsets = [0, 0], sizes = [2, 32], strides = [1, 1]} : vector<2x96xf32> to vector<2x32xf32>
    %209 = vector.extract_strided_slice %207 {offsets = [0, 32], sizes = [2, 32], strides = [1, 1]} : vector<2x96xf32> to vector<2x32xf32>
    %210 = vector.extract_strided_slice %207 {offsets = [0, 64], sizes = [2, 32], strides = [1, 1]} : vector<2x96xf32> to vector<2x32xf32>
    %211 = vector.extract_strided_slice %201 {offsets = [0, 96], sizes = [2, 32], strides = [1, 1]} : vector<2x128xf32> to vector<2x32xf32>
    %212 = math.tanh %211 : vector<2x32xf32>
    %213 = arith.mulf %209, %189 : vector<2x32xf32>
    %214 = arith.mulf %208, %212 : vector<2x32xf32>
    %215 = arith.addf %213, %214 : vector<2x32xf32>
    %216 = math.tanh %215 : vector<2x32xf32>
    %217 = arith.mulf %210, %216 : vector<2x32xf32>
    %218 = arith.index_cast %c7_i32 : i32 to index
    %c0_77 = arith.constant 0 : index
    %c0_78 = arith.constant 0 : index
    %219 = vector.load %arg11[%218, %c0_77, %c0_78] : memref<8x2x32xf32, #tpu.memory_space<vmem>>, vector<1x2x32xf32>
    %220 = vector.shape_cast %219 : vector<1x2x32xf32> to vector<2x32xf32>
    %221 = vector.shape_cast %217 : vector<2x32xf32> to vector<1x2x32xf32>
    tpu.vector_store %arg11[%218, %c0_77, %c0_78], %221 {strides = array<i32>} : memref<8x2x32xf32, #tpu.memory_space<vmem>>, vector<1x2x32xf32>,
    %c8_i32 = arith.constant 8 : i32
    %c0_79 = arith.constant 0 : index
    %c0_80 = arith.constant 0 : index
    %222 = vector.load %arg8[%c0_79, %c0_80] : memref<2x32xf32, #tpu.memory_space<vmem>>, vector<2x32xf32>
    tpu.vector_store %arg8[%c0_79, %c0_80], %217 {strides = array<i32>} : memref<2x32xf32, #tpu.memory_space<vmem>>, vector<2x32xf32>,
    %c0_81 = arith.constant 0 : index
    %c0_82 = arith.constant 0 : index
    %223 = vector.load %arg9[%c0_81, %c0_82] : memref<2x32xf32, #tpu.memory_space<vmem>>, vector<2x32xf32>
    tpu.vector_store %arg9[%c0_81, %c0_82], %215 {strides = array<i32>} : memref<2x32xf32, #tpu.memory_space<vmem>>, vector<2x32xf32>,
    %c0_83 = arith.constant 0 : index
    %c0_84 = arith.constant 0 : index
    %c0_85 = arith.constant 0 : index
    %224 = vector.load %arg11[%c0_83, %c0_84, %c0_85] : memref<8x2x32xf32, #tpu.memory_space<vmem>>, vector<8x2x32xf32>
    %225 = vector.shape_cast %224 : vector<8x2x32xf32> to vector<16x32xf32>
    %c0_86 = arith.constant 0 : index
    %c0_87 = arith.constant 0 : index
    %226 = vector.load %arg5[%c0_86, %c0_87] : memref<32x128xf32, #tpu.memory_space<vmem>>, vector<32x128xf32>
    %cst_88 = arith.constant dense<0.000000e+00> : vector<16x128xf32>
    %227 = tpu.matmul %225, %226, %cst_88 {dimension_numbers = #tpu.dot_dimension_numbers<[1], [0], [0], [1], [0, 0, 1, 1], [], []>} : vector<16x32xf32>, vector<32x128xf32>, vector<16x128xf32> -> vector<16x128xf32>
    %c0_89 = arith.constant 0 : index
    %c0_90 = arith.constant 0 : index
    %228 = vector.load %arg6[%c0_89, %c0_90] : memref<1x128xf32, #tpu.memory_space<vmem>>, vector<1x128xf32>
    %229 = vector.broadcast %228 : vector<1x128xf32> to vector<16x128xf32>
    %230 = arith.addf %227, %229 : vector<16x128xf32>
    %231 = math.tanh %230 : vector<16x128xf32>
    %232 = vector.shape_cast %231 : vector<16x128xf32> to vector<8x2x128xf32>
    %c0_91 = arith.constant 0 : index
    %c0_92 = arith.constant 0 : index
    %c0_93 = arith.constant 0 : index
    %233 = vector.load %arg7[%c0_91, %c0_92, %c0_93] : memref<8x2x128xf32, #tpu.memory_space<vmem>>, vector<8x2x128xf32>
    tpu.vector_store %arg7[%c0_91, %c0_92, %c0_93], %232 {strides = array<i32>} : memref<8x2x128xf32, #tpu.memory_space<vmem>>, vector<8x2x128xf32>,
    return
  }
  func.func @transform_0(%arg0: i32) -> (i32, i32, i32) {
    %c0_i32 = arith.constant 0 : i32
    %c0_i32_0 = arith.constant 0 : i32
    %c0_i32_1 = arith.constant 0 : i32
    return %arg0, %c0_i32, %c0_i32_0 : i32, i32, i32
  }
  func.func @transform_1(%arg0: i32) -> (i32, i32) {
    %c0_i32 = arith.constant 0 : i32
    %c0_i32_0 = arith.constant 0 : i32
    %c0_i32_1 = arith.constant 0 : i32
    return %c0_i32, %c0_i32_0 : i32, i32
  }
  func.func @transform_2(%arg0: i32) -> (i32, i32) {
    %c0_i32 = arith.constant 0 : i32
    %c0_i32_0 = arith.constant 0 : i32
    %c0_i32_1 = arith.constant 0 : i32
    return %c0_i32, %c0_i32_0 : i32, i32
  }
  func.func @transform_3(%arg0: i32) -> (i32, i32) {
    %c0_i32 = arith.constant 0 : i32
    %c0_i32_0 = arith.constant 0 : i32
    %c0_i32_1 = arith.constant 0 : i32
    return %c0_i32, %c0_i32_0 : i32, i32
  }
  func.func @transform_4(%arg0: i32) -> (i32, i32) {
    %c0_i32 = arith.constant 0 : i32
    %c0_i32_0 = arith.constant 0 : i32
    %c0_i32_1 = arith.constant 0 : i32
    return %c0_i32, %c0_i32_0 : i32, i32
  }
  func.func @transform_5(%arg0: i32) -> (i32, i32) {
    %c0_i32 = arith.constant 0 : i32
    %c0_i32_0 = arith.constant 0 : i32
    %c0_i32_1 = arith.constant 0 : i32
    return %c0_i32, %c0_i32_0 : i32, i32
  }
  func.func @transform_6(%arg0: i32) -> (i32, i32, i32) {
    %c0_i32 = arith.constant 0 : i32
    %c0_i32_0 = arith.constant 0 : i32
    %c0_i32_1 = arith.constant 0 : i32
    return %arg0, %c0_i32, %c0_i32_0 : i32, i32, i32
  }
}

</mosaic_0001>

<bundles_post_ra>
// kernel: lstm_g_forward.1
= control target key start
LH: loop header
LB: loop body
LE: loop exit
PB: predicated region body
PF: predicated region fallthrough
CT: control target
= control target key end

     0   :  { %11 = vsyncpa [#allocation7], 0  ;;  %s1667_s21 = smov [#allocation6]   ;;  %s1923_s0 = inlined_call_operand.vmem [shape: f32[8,2,16], index: 0, kind: input, shape index: {}]   ;;  %s1924_s1 = inlined_call_operand.vmem [shape: f32[16,128], index: 1, kind: input, shape index: {}]   ;;  %s1925_s2 = inlined_call_operand.vmem [shape: f32[32,128], index: 2, kind: input, shape index: {}]   ;;  %s1926_s3 = inlined_call_operand.vmem [shape: f32[1,128], index: 3, kind: input, shape index: {}]   ;;  %s1927_s4 = inlined_call_operand.hbm [shape: f32[32,128], index: 4, kind: input, shape index: {}]   ;;  %s1928_s5 = inlined_call_operand.vmem [shape: f32[1,128], index: 5, kind: input, shape index: {}]   ;;  %s1929_s6 = inlined_call_operand.vmem [shape: f32[8,2,128], index: 6, kind: output, shape index: {}]  }
   0x1   :  { %s25_s22 = sshll.u32 %s1667_s21, 4  ;;  %s1643_s25 = scalar_lea.hbm %s1927_s4, 512  ;;  %s26_s22 = int_to_ptr.vmem [resolvable:$true] %s25_s22 }
   0x2   :  { %p1644_p0 = scmp.ne.s32.totalorder %s1927_s4, %s1643_s25  ;;  %p1647_p1 = scmp.lt.u32.totalorder %s1643_s25, %s1927_s4 }
   0x4   :  { %p1649_p2 = pnand %p1647_p1, %p1644_p0 }
   0x6   :  { %1652 = shalt.err (!%p1649_p2)
}
   0x7   :  { %s1653_s30 = scalar_lea.vmem %s26_s22, 512  ;;  %p1658_p4 = scmp.lt.s32.totalorder %s26_s22, %s26_s22 }
   0x8   :  { %p1654_p3 = scmp.ne.s32.totalorder %s26_s22, %s1653_s30  ;;  %p1659_p5 = scmp.lt.s32.totalorder %s1653_s30, %s1653_s30 }
   0xa   :  { %p1660_p6 = por %p1659_p5, %p1658_p4 }
   0xc   :  { %p1661_p7 = pnand %p1660_p6, %p1654_p3 }
   0xe   :  { %1664 = shalt.err (!%p1661_p7)
}
   0xf   :  { %s1668_s7 = smov 128   ;;  %s1669_s8 = smov 8  }
  0x10   :  { %31 = dma.hbm_to_vmem [thread:$0]  %s1927_s4, 512, %s26_s22, [#allocation7], %s1668_s7, %s1668_s7, %s1669_s8  }
  0x11   :  { %1665 = dma.done.wait [#allocation7], 512  }
  0x12   :  { %1666 = vsyncadd [#allocation7], 4294966784  ;;  %v74_v0 = vlaneseq  ;;  %v1670_v1 = vmov 1983009808   ;;  %v1671_v3 = vmov 0.0|0.0   ;;  %vm41_vm0 = vcmask 254976  }
  0x13   :  { %v72_v2 = vunpack.c.l.s4 %v1670_v1  ;;  %1509 = vmatprep.subr.bf16.mxu1 %v1671_v3  ;;  %vm1672_vm1 = vmmov 0   ;;  %v1673_v4 = vmov 0.0   ;;  %v52_v7 = vld [vmem:[%s1924_s1] sm:$0xff]  ;;  %v53_v8 = vld [vmem:[%s1924_s1 + $0x8] sm:$0xff]  ;;  %v240_v28 = vld [vmem:[%s1925_s2 + $0x10] sm:$0xff]  ;;  %vm103_vm2 = vcmask 130048  }
  0x14   :  { %1414 = vmatprep.mubr.msk.f32.mxu1 %vm1672_vm1, %v1673_v4  ;;  %42 = vst.msk [vmem:[#allocation2] sm:$0x3] %vm41_vm0, %v1673_v4  ;;  %43 = vst.msk [vmem:[#allocation3] sm:$0x3] %vm41_vm0, %v1673_v4  ;;  %v75_v6 = vshrl.u32 %v74_v0, 7  ;;  %v1505_v11 = vpack.c.bf16 %v53_v8, %v52_v7  ;;  %v238_v22 = vld [vmem:[%s1925_s2] sm:$0xff] }
  0x15   :  { %v73_v5 = vunpack.c.0.s8 %v72_v2  ;;  %v44_v9 = vld [vmem:[%s1923_s0] sm:$0x3]  ;;  %v45_v12 = vld [vmem:[%s1923_s0 + $0x2] sm:$0x3]  ;;  %v46_v13 = vld [vmem:[%s1923_s0 + $0x4] sm:$0x3] }
  0x16   :  { %v47_v14 = vld [vmem:[%s1923_s0 + $0x6] sm:$0x3]  ;;  %v69_v15 = vcombine.low %v44_v9, %v45_v12  ;;  %v48_v17 = vld [vmem:[%s1923_s0 + $0x8] sm:$0x3]  ;;  %v49_v18 = vld [vmem:[%s1923_s0 + $0xa] sm:$0x3]  ;;  %1506 = vmatprep.subr.bf16.mxu0 %v1505_v11 }
  0x17   :  { %v1740_v10 = vsub.s32 %v73_v5, %v75_v6  ;;  %v70_v16 = vcombine.low %v46_v13, %v47_v14  ;;  %v50_v19 = vld [vmem:[%s1923_s0 + $0xc] sm:$0x3]  ;;  %v51_v20 = vld [vmem:[%s1923_s0 + $0xe] sm:$0x3]  ;;  %v86_v21 = vcombine.low %v48_v17, %v49_v18  ;;  %1508 = vmatpush3.bf16.msra.mxu0 %v1505_v11  ;;  %v241_v29 = vld [vmem:[%s1925_s2 + $0x18] sm:$0xff]  ;;  %vm242_vm3 = vcmask 261120  }
  0x18   :  { %v239_v23 = vld [vmem:[%s1925_s2 + $0x8] sm:$0xff]  ;;  %v87_v26 = vcombine.low %v50_v19, %v51_v20  ;;  %1515 = vmatprep.subr.bf16.mxu0 %v1671_v3  ;;  %v1783_v33 = vpack.c.bf16 %v241_v29, %v240_v28  ;;  %v1319_v36 = vld [vmem:[%s1926_s3] ss:$0 sm:$0xff]  ;;  %s1674_s3 = smov 32   ;;  %s1675_s12 = smov 64  }
  0x19   :  { %v77_v24 = vrot.slane %v69_v15, %v1740_v10  ;;  %v84_v25 = vrot.slane %v70_v16, %v1740_v10  ;;  %v1771_v27 = vpack.c.bf16 %v239_v23, %v238_v22  ;;  %v94_v30 = vrot.slane %v86_v21, %v1740_v10  ;;  %s1676_s13 = smov 96  }
  0x1a   :  { %v101_v32 = vrot.slane %v87_v26, %v1740_v10 }
  0x1b   :  { %v85_v31 = vcombine.low %v77_v24, %v84_v25  ;;  %1511 = vmatpush3.bf16.msra.mxu1 %v1771_v27  ;;  %v235_v35 = vld [vmem:[#allocation2] sm:$0x3]  ;;  %v236_v56 = vld [vmem:[#allocation3] sm:$0x3] }
  0x1c   :  { %1512 = vmatprep.subr.bf16.mxu1 %v1671_v3  ;;  %v102_v34 = vcombine.low %v94_v30, %v101_v32 }
  0x1d   :  { %1403 = vmatprep.mubr.msk.f32.mxu0 %vm103_vm2, %v85_v31 }
  0x1e   :  { %1404 = vmatmul.mubr.msk.f32.vlgmr.msra.gmra.mrb[0].mxu0 %vm103_vm2, %v102_v34 }
  0x1f   :  { %1514 = vmatpush3.bf16.msra.mxu1 %v1783_v33  ;;  %1517 = vmatpush3.bf16.msra.mxu0 %v1771_v27 }
  0x20   :  { %1425 = vmatprep.mubr.msk.f32.mxu0 %vm1672_vm1, %v1673_v4  ;;  %1518 = vmatprep.subr.bf16.mxu0 %v1671_v3 }
  0x21   :  { %1521 = vmatprep.subr.bf16.mxu1 %v1671_v3 }
  0x22   :  { %1415 = vmatmul.mubr.msk.f32.vlgmr.msra.gmra.mrb[0].mxu1 %vm242_vm3, %v235_v35 }
  0x23   :  { %1523 = vmatpush3.bf16.msra.mxu1 %v1771_v27  ;;  %1436 = vmatprep.mubr.msk.f32.mxu1 %vm1672_vm1, %v1673_v4 }
  0x24   :  { %1520 = vmatpush3.bf16.msra.mxu0 %v1783_v33  ;;  %1524 = vmatprep.subr.bf16.mxu1 %v1671_v3 }
  0x25   :  { %1527 = vmatprep.subr.bf16.mxu0 %v1671_v3 }
  0x27   :  { %1526 = vmatpush3.bf16.msra.mxu1 %v1783_v33 }
  0x28   :  { %1533 = vmatprep.subr.bf16.mxu1 %v1671_v3 }
  0xf1   :  { %v1405_v37 = vpop.f32.mrb[0].mxu0 }
  0xf2   :  { %v180_v38 = vadd.f32 %v1405_v37, %v1319_v36  ;;  %v174_v39 = vpop.f32.mrb[1].mxu0 }
  0xf3   :  { %v175_v40 = vadd.f32 %v1319_v36, %v174_v39 }
  0xf4   :  { %v202_v41 = vcombine.high %v180_v38, %v180_v38  ;;  %v209_v42 = vrot.slane %v180_v38, %v1740_v10  ;;  %1324 = vst.sshfl [vmem:[#allocation4 + $0x8] sm:$0x3 pattern:$0x76325410] %v180_v38 }
  0xf5   :  { %v312_v43 = vpop.f32.mrb[0].mxu1  ;;  %v185_v44 = vcombine.high %v175_v40, %v175_v40  ;;  %v192_v45 = vrot.slane %v175_v40, %v1740_v10  ;;  %1322 = vst.sshfl [vmem:[#allocation4] sm:$0x3 pattern:$0x76325410] %v175_v40 }
  0xf6   :  { %v1416_v46 = vpop.f32.mrb[1].mxu1  ;;  %v216_v47 = vrot.slane %v202_v41, %v1740_v10  ;;  %v217_v48 = vcombine.high %v209_v42, %v209_v42  ;;  %1325 = vst.sshfl [vmem:[#allocation4 + $0xc] sm:$0x3 pattern:$0x76325410] %v202_v41 }
  0xf7   :  { %v199_v49 = vrot.slane %v185_v44, %v1740_v10  ;;  %v200_v50 = vcombine.high %v192_v45, %v192_v45  ;;  %1323 = vst.sshfl [vmem:[#allocation4 + $0x4] sm:$0x3 pattern:$0x76325410] %v185_v44 }
  0xf8   :  { %v218_v51 = vcombine.high %v216_v47, %v216_v47  ;;  %232 = vst [vmem:[#allocation4 + $0xa] sm:$0x3] %v217_v48 }
  0xf9   :  { %v201_v52 = vcombine.high %v199_v49, %v199_v49  ;;  %228 = vst [vmem:[#allocation4 + $0x2] sm:$0x3] %v200_v50 }
  0xfa   :  { %234 = vst [vmem:[#allocation4 + $0xe] sm:$0x3] %v218_v51 }
  0xfb   :  { %230 = vst [vmem:[#allocation4 + $0x6] sm:$0x3] %v201_v52 }
  0xfc   :  { %v237_v53 = vld [vmem:[#allocation4] sm:$0x3] }
  0xfd   :  { %v316_v54 = vadd.f32 %v312_v43, %v237_v53 }
  0xfe   :  { %v461_v29 = vld [vmem:[#allocation4 + $0x4] sm:$0x3] }
  0xff   :  { %1575 = vtanh.f32 %v316_v54  ;;  %v1327_v57 = vmul.f32 -1.442695, %v316_v54 }
 0x100   :  { %v352_v9 = vld [vmem:[#allocation4 + $0x2] sm:$0x3] }
 0x101   :  { %1577 = vpow2.f32 %v1327_v57 }
 0x102   :  { %v570_v48 = vld [vmem:[#allocation4 + $0x6] sm:$0x3] }
 0x109   :  { %v1576_v55 = vpop.eup %1575 }
 0x10a   :  { %330 = vrot.lane.b32.xlu0 %v1576_v55, %s1674_s3 }
 0x10b   :  { %v1578_v58 = vpop.eup %1577 }
 0x10c   :  { %v320_v59 = vadd.f32 1.0, %v1578_v58 }
 0x10e   :  { %325 = vrot.lane.b32.xlu0 %v236_v56, %s1674_s3  ;;  %1579 = vrcp.f32 %v320_v59 }
 0x118   :  { %v1580_v60 = vpop.eup %1579 }
 0x17c   :  { %v331_v61 = vpop.permute.xlu0 %330 }
 0x17d   :  { %v333_v62 = vmul.f32 %v1580_v60, %v331_v61 }
 0x17f   :  { %335 = vrot.lane.b32.xlu1 %v333_v62, %s1674_s3 }
 0x180   :  { %v326_v63 = vpop.permute.xlu0 %325 }
 0x181   :  { %v328_v0 = vmul.f32 %v1580_v60, %v326_v63 }
 0x1f1   :  { %v336_v1 = vpop.permute.xlu1 %335 }
 0x1f2   :  { %v338_v2 = vadd.f32 %v336_v1, %v328_v0 }
 0x1f4   :  { %1581 = vtanh.f32 %v338_v2 }
 0x1fe   :  { %v1582_v5 = vpop.eup %1581 }
 0x1ff   :  { %341 = vrot.lane.b32.xlu1 %v1582_v5, %s1674_s3 }
 0x271   :  { %v342_v6 = vpop.permute.xlu1 %341 }
 0x272   :  { %v344_v7 = vmul.f32 %v1580_v60, %v342_v6 }
 0x274   :  { %346 = vrot.lane.b32.xlu0 %v344_v7, %s1675_s12 }
 0x2e6   :  { %v347_v8 = vpop.permute.xlu0 %346 }
 0x2e7   :  { %350 = vst.msk [vmem:[#allocation5] sm:$0x3] %vm41_vm0, %v347_v8  ;;  %1426 = vmatmul.mubr.msk.f32.vlgmr.msra.gmra.mrb[2].mxu0 %vm242_vm3, %v347_v8 }
 0x2e8   :  { %1529 = vmatpush3.bf16.msra.mxu0 %v1771_v27  ;;  %1447 = vmatprep.mubr.msk.f32.mxu0 %vm1672_vm1, %v1673_v4 }
 0x2e9   :  { %1530 = vmatprep.subr.bf16.mxu0 %v1671_v3 }
 0x2ec   :  { %1532 = vmatpush3.bf16.msra.mxu0 %v1783_v33 }
 0x2ed   :  { %1539 = vmatprep.subr.bf16.mxu0 %v1671_v3 }
 0x3ba   :  { %v425_v11 = vpop.f32.mrb[2].mxu0 }
 0x3bb   :  { %v429_v12 = vadd.f32 %v425_v11, %v352_v9  ;;  %v1427_v13 = vpop.f32.mrb[3].mxu0 }
 0x3bd   :  { %1583 = vtanh.f32 %v429_v12  ;;  %v1329_v15 = vmul.f32 -1.442695, %v429_v12 }
 0x3bf   :  { %1585 = vpow2.f32 %v1329_v15 }
 0x3c7   :  { %v1584_v14 = vpop.eup %1583 }
 0x3c8   :  { %439 = vrot.lane.b32.xlu1 %v1584_v14, %s1674_s3 }
 0x3c9   :  { %v1586_v16 = vpop.eup %1585 }
 0x3ca   :  { %v433_v17 = vadd.f32 1.0, %v1586_v16 }
 0x3cc   :  { %1587 = vrcp.f32 %v433_v17 }
 0x3d6   :  { %v1588_v18 = vpop.eup %1587 }
 0x3d7   :  { %v437_v21 = vmul.f32 %v1588_v18, %v338_v2  ;;  %v679_v2 = vld [vmem:[#allocation4 + $0x8] sm:$0x3] }
 0x43a   :  { %v440_v19 = vpop.permute.xlu1 %439 }
 0x43b   :  { %v442_v20 = vmul.f32 %v1588_v18, %v440_v19 }
 0x43d   :  { %444 = vrot.lane.b32.xlu0 %v442_v20, %s1674_s3 }
 0x4af   :  { %v445_v22 = vpop.permute.xlu0 %444 }
 0x4b0   :  { %v447_v23 = vadd.f32 %v445_v22, %v437_v21 }
 0x4b2   :  { %1589 = vtanh.f32 %v447_v23 }
 0x4bc   :  { %v1590_v24 = vpop.eup %1589 }
 0x4bd   :  { %450 = vrot.lane.b32.xlu1 %v1590_v24, %s1674_s3 }
 0x52f   :  { %v451_v25 = vpop.permute.xlu1 %450 }
 0x530   :  { %v453_v26 = vmul.f32 %v1588_v18, %v451_v25 }
 0x532   :  { %455 = vrot.lane.b32.xlu0 %v453_v26, %s1675_s12 }
 0x5a4   :  { %v456_v28 = vpop.permute.xlu0 %455 }
 0x5a5   :  { %459 = vst.msk [vmem:[#allocation5 + $0x2] sm:$0x3] %vm41_vm0, %v456_v28  ;;  %1437 = vmatmul.mubr.msk.f32.vlgmr.msra.gmra.mrb[2].mxu1 %vm242_vm3, %v456_v28 }
 0x5a6   :  { %1535 = vmatpush3.bf16.msra.mxu1 %v1771_v27  ;;  %1458 = vmatprep.mubr.msk.f32.mxu1 %vm1672_vm1, %v1673_v4 }
 0x5a7   :  { %1536 = vmatprep.subr.bf16.mxu1 %v1671_v3 }
 0x5aa   :  { %1538 = vmatpush3.bf16.msra.mxu1 %v1783_v33 }
 0x5ab   :  { %1545 = vmatprep.subr.bf16.mxu1 %v1671_v3 }
 0x678   :  { %v534_v30 = vpop.f32.mrb[2].mxu1 }
 0x679   :  { %v538_v31 = vadd.f32 %v534_v30, %v461_v29  ;;  %v1438_v32 = vpop.f32.mrb[3].mxu1 }
 0x67b   :  { %1591 = vtanh.f32 %v538_v31  ;;  %v1331_v35 = vmul.f32 -1.442695, %v538_v31 }
 0x67d   :  { %1593 = vpow2.f32 %v1331_v35 }
 0x685   :  { %v1592_v34 = vpop.eup %1591 }
 0x686   :  { %548 = vrot.lane.b32.xlu1 %v1592_v34, %s1674_s3 }
 0x687   :  { %v1594_v36 = vpop.eup %1593 }
 0x688   :  { %v542_v37 = vadd.f32 1.0, %v1594_v36 }
 0x68a   :  { %1595 = vrcp.f32 %v542_v37 }
 0x694   :  { %v1596_v38 = vpop.eup %1595 }
 0x695   :  { %v546_v41 = vmul.f32 %v1596_v38, %v447_v23  ;;  %v788_v23 = vld [vmem:[#allocation4 + $0xa] sm:$0x3] }
 0x6f8   :  { %v549_v39 = vpop.permute.xlu1 %548 }
 0x6f9   :  { %v551_v40 = vmul.f32 %v1596_v38, %v549_v39  ;;  %v1121_v39 = vld [vmem:[#allocation5 + $0x2] sm:$0x3] }
 0x6fb   :  { %553 = vrot.lane.b32.xlu0 %v551_v40, %s1674_s3 }
 0x76d   :  { %v554_v42 = vpop.permute.xlu0 %553 }
 0x76e   :  { %v556_v43 = vadd.f32 %v554_v42, %v546_v41  ;;  %v1120_v42 = vld [vmem:[#allocation5] sm:$0x3] }
 0x770   :  { %1597 = vtanh.f32 %v556_v43 }
 0x77a   :  { %v1598_v44 = vpop.eup %1597 }
 0x77b   :  { %559 = vrot.lane.b32.xlu1 %v1598_v44, %s1674_s3 }
 0x7ed   :  { %v560_v45 = vpop.permute.xlu1 %559 }
 0x7ee   :  { %v562_v46 = vmul.f32 %v1596_v38, %v560_v45 }
 0x7f0   :  { %564 = vrot.lane.b32.xlu0 %v562_v46, %s1675_s12 }
 0x862   :  { %v565_v47 = vpop.permute.xlu0 %564 }
 0x863   :  { %568 = vst.msk [vmem:[#allocation5 + $0x4] sm:$0x3] %vm41_vm0, %v565_v47  ;;  %1448 = vmatmul.mubr.msk.f32.vlgmr.msra.gmra.mrb[4].mxu0 %vm242_vm3, %v565_v47 }
 0x864   :  { %1541 = vmatpush3.bf16.msra.mxu0 %v1771_v27  ;;  %1469 = vmatprep.mubr.msk.f32.mxu0 %vm1672_vm1, %v1673_v4 }
 0x865   :  { %1542 = vmatprep.subr.bf16.mxu0 %v1671_v3 }
 0x868   :  { %1544 = vmatpush3.bf16.msra.mxu0 %v1783_v33 }
 0x869   :  { %1551 = vmatprep.subr.bf16.mxu0 %v1671_v3 }
 0x86a   :  { %v1122_v40 = vld [vmem:[#allocation5 + $0x4] sm:$0x3] }
 0x936   :  { %v643_v49 = vpop.f32.mrb[4].mxu0 }
 0x937   :  { %v647_v50 = vadd.f32 %v643_v49, %v570_v48  ;;  %v1449_v51 = vpop.f32.mrb[5].mxu0  ;;  %v897_v48 = vld [vmem:[#allocation4 + $0xc] sm:$0x3] }
 0x939   :  { %1599 = vtanh.f32 %v647_v50  ;;  %v1333_v53 = vmul.f32 -1.442695, %v647_v50 }
 0x93b   :  { %1601 = vpow2.f32 %v1333_v53 }
 0x943   :  { %v1600_v52 = vpop.eup %1599 }
 0x944   :  { %657 = vrot.lane.b32.xlu1 %v1600_v52, %s1674_s3 }
 0x945   :  { %v1602_v54 = vpop.eup %1601 }
 0x946   :  { %v651_v55 = vadd.f32 1.0, %v1602_v54 }
 0x948   :  { %1603 = vrcp.f32 %v651_v55 }
 0x952   :  { %v1604_v56 = vpop.eup %1603 }
 0x953   :  { %v655_v59 = vmul.f32 %v1604_v56, %v556_v43  ;;  %v1147_v43 = vcombine.low %v1120_v42, %v1121_v39 }
 0x955   :  { %v1155_v45 = vrot.slane %v1147_v43, %v1740_v10 }
 0x9b6   :  { %v658_v57 = vpop.permute.xlu1 %657 }
 0x9b7   :  { %v660_v58 = vmul.f32 %v1604_v56, %v658_v57 }
 0x9b9   :  { %662 = vrot.lane.b32.xlu0 %v660_v58, %s1674_s3 }
 0xa2b   :  { %v663_v60 = vpop.permute.xlu0 %662 }
 0xa2c   :  { %v665_v61 = vadd.f32 %v663_v60, %v655_v59 }
 0xa2e   :  { %1605 = vtanh.f32 %v665_v61 }
 0xa38   :  { %v1606_v62 = vpop.eup %1605 }
 0xa39   :  { %668 = vrot.lane.b32.xlu1 %v1606_v62, %s1674_s3 }
 0xaab   :  { %v669_v63 = vpop.permute.xlu1 %668 }
 0xaac   :  { %v671_v0 = vmul.f32 %v1604_v56, %v669_v63 }
 0xaae   :  { %673 = vrot.lane.b32.xlu0 %v671_v0, %s1675_s12 }
 0xb20   :  { %v674_v1 = vpop.permute.xlu0 %673 }
 0xb21   :  { %677 = vst.msk [vmem:[#allocation5 + $0x6] sm:$0x3] %vm41_vm0, %v674_v1  ;;  %1459 = vmatmul.mubr.msk.f32.vlgmr.msra.gmra.mrb[4].mxu1 %vm242_vm3, %v674_v1 }
 0xb22   :  { %1547 = vmatpush3.bf16.msra.mxu1 %v1771_v27  ;;  %1480 = vmatprep.mubr.msk.f32.mxu1 %vm1672_vm1, %v1673_v4 }
 0xb23   :  { %1548 = vmatprep.subr.bf16.mxu1 %v1671_v3 }
 0xb26   :  { %1550 = vmatpush3.bf16.msra.mxu1 %v1783_v33 }
 0xb28   :  { %v1123_v38 = vld [vmem:[#allocation5 + $0x6] sm:$0x3] }
 0xb29   :  { %v1148_v41 = vcombine.low %v1122_v40, %v1123_v38 }
 0xb2b   :  { %v1162_v44 = vrot.slane %v1148_v41, %v1740_v10 }
 0xb2d   :  { %v1163_v47 = vcombine.low %v1155_v45, %v1162_v44 }
 0xbf4   :  { %v752_v5 = vpop.f32.mrb[4].mxu1 }
 0xbf5   :  { %v756_v6 = vadd.f32 %v752_v5, %v679_v2  ;;  %v1460_v7 = vpop.f32.mrb[5].mxu1  ;;  %v1006_v2 = vld [vmem:[#allocation4 + $0xe] sm:$0x3] }
 0xbf7   :  { %1607 = vtanh.f32 %v756_v6  ;;  %v1335_v9 = vmul.f32 -1.442695, %v756_v6 }
 0xbf9   :  { %1609 = vpow2.f32 %v1335_v9 }
 0xc01   :  { %v1608_v8 = vpop.eup %1607 }
 0xc02   :  { %766 = vrot.lane.b32.xlu1 %v1608_v8, %s1674_s3 }
 0xc03   :  { %v1610_v11 = vpop.eup %1609 }
 0xc04   :  { %v760_v12 = vadd.f32 1.0, %v1610_v11 }
 0xc06   :  { %1611 = vrcp.f32 %v760_v12 }
 0xc10   :  { %v1612_v13 = vpop.eup %1611 }
 0xc11   :  { %v764_v16 = vmul.f32 %v1612_v13, %v665_v61 }
 0xc74   :  { %v767_v14 = vpop.permute.xlu1 %766 }
 0xc75   :  { %v769_v15 = vmul.f32 %v1612_v13, %v767_v14 }
 0xc77   :  { %771 = vrot.lane.b32.xlu0 %v769_v15, %s1674_s3 }
 0xce9   :  { %v772_v17 = vpop.permute.xlu0 %771 }
 0xcea   :  { %v774_v18 = vadd.f32 %v772_v17, %v764_v16 }
 0xcec   :  { %1613 = vtanh.f32 %v774_v18 }
 0xcf6   :  { %v1614_v19 = vpop.eup %1613 }
 0xcf7   :  { %777 = vrot.lane.b32.xlu1 %v1614_v19, %s1674_s3 }
 0xd69   :  { %v778_v20 = vpop.permute.xlu1 %777 }
 0xd6a   :  { %v780_v21 = vmul.f32 %v1612_v13, %v778_v20  ;;  %v1128_v20 = vld [vmem:[#allocation6] sm:$0xff] }
 0xd6c   :  { %782 = vrot.lane.b32.xlu0 %v780_v21, %s1675_s12  ;;  %v1129_v21 = vld [vmem:[#allocation6 + $0x8] sm:$0xff] }
 0xdde   :  { %v783_v22 = vpop.permute.xlu0 %782 }
 0xddf   :  { %786 = vst.msk [vmem:[#allocation5 + $0x8] sm:$0x3] %vm41_vm0, %v783_v22  ;;  %1470 = vmatmul.mubr.msk.f32.vlgmr.msra.gmra.mrb[6].mxu0 %vm242_vm3, %v783_v22  ;;  %v1130_v22 = vld [vmem:[#allocation6 + $0x10] sm:$0xff] }
 0xde0   :  { %1553 = vmatpush3.bf16.msra.mxu0 %v1771_v27  ;;  %1491 = vmatprep.mubr.msk.f32.mxu0 %vm1672_vm1, %v1673_v4 }
 0xde1   :  { %1554 = vmatprep.subr.bf16.mxu0 %v1671_v3 }
 0xde4   :  { %1556 = vmatpush3.bf16.msra.mxu0 %v1783_v33 }
 0xeb2   :  { %v861_v24 = vpop.f32.mrb[6].mxu0 }
 0xeb3   :  { %v865_v25 = vadd.f32 %v861_v24, %v788_v23  ;;  %v1471_v26 = vpop.f32.mrb[7].mxu0  ;;  %v1557_v23 = vpack.c.bf16 %v1129_v21, %v1128_v20  ;;  %v1131_v24 = vld [vmem:[#allocation6 + $0x18] sm:$0xff] }
 0xeb5   :  { %1615 = vtanh.f32 %v865_v25  ;;  %v1337_v29 = vmul.f32 -1.442695, %v865_v25  ;;  %v1561_v25 = vpack.c.bf16 %v1131_v24, %v1130_v22  ;;  %1558 = vmatprep.subr.bf16.mxu1 %v1557_v23 }
 0xeb7   :  { %1617 = vpow2.f32 %v1337_v29 }
 0xebf   :  { %v1616_v28 = vpop.eup %1615 }
 0xec0   :  { %875 = vrot.lane.b32.xlu1 %v1616_v28, %s1674_s3 }
 0xec1   :  { %v1618_v30 = vpop.eup %1617 }
 0xec2   :  { %v869_v31 = vadd.f32 1.0, %v1618_v30 }
 0xec4   :  { %1619 = vrcp.f32 %v869_v31 }
 0xece   :  { %v1620_v27 = vpop.eup %1619 }
 0xecf   :  { %v873_v3 = vmul.f32 %v1620_v27, %v774_v18 }
 0xf32   :  { %v876_v32 = vpop.permute.xlu1 %875 }
 0xf33   :  { %v878_v4 = vmul.f32 %v1620_v27, %v876_v32 }
 0xf35   :  { %880 = vrot.lane.b32.xlu0 %v878_v4, %s1674_s3 }
 0xfa7   :  { %v881_v33 = vpop.permute.xlu0 %880 }
 0xfa8   :  { %v883_v34 = vadd.f32 %v881_v33, %v873_v3 }
 0xfaa   :  { %1621 = vtanh.f32 %v883_v34 }
 0xfb4   :  { %v1622_v35 = vpop.eup %1621 }
 0xfb5   :  { %886 = vrot.lane.b32.xlu1 %v1622_v35, %s1674_s3 }
0x1027   :  { %v887_v36 = vpop.permute.xlu1 %886 }
0x1028   :  { %v889_v37 = vmul.f32 %v1620_v27, %v887_v36  ;;  %v1124_v27 = vld [vmem:[#allocation5 + $0x8] sm:$0x3] }
0x102a   :  { %891 = vrot.lane.b32.xlu0 %v889_v37, %s1675_s12  ;;  %v1342_v37 = vld [vmem:[%s1928_s5] ss:$0 sm:$0xff] }
0x109c   :  { %v892_v46 = vpop.permute.xlu0 %891 }
0x109d   :  { %895 = vst.msk [vmem:[#allocation5 + $0xa] sm:$0x3] %vm41_vm0, %v892_v46  ;;  %1481 = vmatmul.mubr.msk.f32.vlgmr.msra.gmra.mrb[6].mxu1 %vm242_vm3, %v892_v46 }
0x109e   :  { %1502 = vmatprep.mubr.msk.f32.mxu1 %vm242_vm3, %v1163_v47  ;;  %1560 = vmatpush3.bf16.msra.mxu1 %v1557_v23 }
0x109f   :  { %1562 = vmatprep.subr.bf16.mxu1 %v1561_v25 }
0x10a2   :  { %1564 = vmatpush3.bf16.msra.mxu1 %v1561_v25 }
0x10a4   :  { %v1125_v31 = vld [vmem:[#allocation5 + $0xa] sm:$0x3] }
0x10a5   :  { %v1164_v32 = vcombine.low %v1124_v27, %v1125_v31 }
0x1170   :  { %v970_v49 = vpop.f32.mrb[6].mxu1 }
0x1171   :  { %v974_v50 = vadd.f32 %v970_v49, %v897_v48  ;;  %v1482_v51 = vpop.f32.mrb[7].mxu1 }
0x1173   :  { %1623 = vtanh.f32 %v974_v50  ;;  %v1339_v53 = vmul.f32 -1.442695, %v974_v50 }
0x1175   :  { %1625 = vpow2.f32 %v1339_v53 }
0x117d   :  { %v1624_v52 = vpop.eup %1623 }
0x117e   :  { %984 = vrot.lane.b32.xlu1 %v1624_v52, %s1674_s3 }
0x117f   :  { %v1626_v54 = vpop.eup %1625 }
0x1180   :  { %v978_v55 = vadd.f32 1.0, %v1626_v54 }
0x1182   :  { %1627 = vrcp.f32 %v978_v55 }
0x118c   :  { %v1628_v56 = vpop.eup %1627 }
0x118d   :  { %v982_v59 = vmul.f32 %v1628_v56, %v883_v34  ;;  %v1172_v34 = vrot.slane %v1164_v32, %v1740_v10 }
0x11f0   :  { %v985_v57 = vpop.permute.xlu1 %984 }
0x11f1   :  { %v987_v58 = vmul.f32 %v1628_v56, %v985_v57 }
0x11f3   :  { %989 = vrot.lane.b32.xlu0 %v987_v58, %s1674_s3 }
0x1265   :  { %v990_v60 = vpop.permute.xlu0 %989 }
0x1266   :  { %v992_v61 = vadd.f32 %v990_v60, %v982_v59 }
0x1268   :  { %1629 = vtanh.f32 %v992_v61 }
0x1272   :  { %v1630_v62 = vpop.eup %1629 }
0x1273   :  { %995 = vrot.lane.b32.xlu1 %v1630_v62, %s1674_s3 }
0x12e5   :  { %v996_v63 = vpop.permute.xlu1 %995 }
0x12e6   :  { %v998_v0 = vmul.f32 %v1628_v56, %v996_v63 }
0x12e8   :  { %1000 = vrot.lane.b32.xlu0 %v998_v0, %s1675_s12 }
0x135a   :  { %v1001_v1 = vpop.permute.xlu0 %1000 }
0x135b   :  { %1004 = vst.msk [vmem:[#allocation5 + $0xc] sm:$0x3] %vm41_vm0, %v1001_v1  ;;  %1492 = vmatmul.mubr.msk.f32.vlgmr.msra.gmra.mrb[8].mxu0 %vm242_vm3, %v1001_v1 }
0x1362   :  { %v1126_v4 = vld [vmem:[#allocation5 + $0xc] sm:$0x3] }
0x142e   :  { %v1079_v5 = vpop.f32.mrb[8].mxu0 }
0x142f   :  { %v1083_v6 = vadd.f32 %v1079_v5, %v1006_v2  ;;  %v1493_v7 = vpop.f32.mrb[9].mxu0 }
0x1431   :  { %1631 = vtanh.f32 %v1083_v6  ;;  %v1341_v9 = vmul.f32 -1.442695, %v1083_v6 }
0x1433   :  { %1633 = vpow2.f32 %v1341_v9 }
0x143b   :  { %v1632_v8 = vpop.eup %1631 }
0x143c   :  { %1093 = vrot.lane.b32.xlu1 %v1632_v8, %s1674_s3 }
0x143d   :  { %v1634_v11 = vpop.eup %1633 }
0x143e   :  { %v1087_v12 = vadd.f32 1.0, %v1634_v11 }
0x1440   :  { %1635 = vrcp.f32 %v1087_v12 }
0x144a   :  { %v1636_v13 = vpop.eup %1635 }
0x144b   :  { %v1091_v16 = vmul.f32 %v1636_v13, %v992_v61 }
0x14ae   :  { %v1094_v14 = vpop.permute.xlu1 %1093 }
0x14af   :  { %v1096_v15 = vmul.f32 %v1636_v13, %v1094_v14 }
0x14b1   :  { %1098 = vrot.lane.b32.xlu0 %v1096_v15, %s1674_s3 }
0x1523   :  { %v1099_v17 = vpop.permute.xlu0 %1098 }
0x1524   :  { %v1101_v18 = vadd.f32 %v1099_v17, %v1091_v16 }
0x1526   :  { %1637 = vtanh.f32 %v1101_v18 }
0x1530   :  { %v1638_v19 = vpop.eup %1637 }
0x1531   :  { %1104 = vrot.lane.b32.xlu1 %v1638_v19, %s1674_s3 }
0x1535   :  { %1116 = vrot.lane.b32.xlu1 %v1101_v18, %s1676_s13 }
0x15a3   :  { %v1105_v26 = vpop.permute.xlu1 %1104 }
0x15a4   :  { %v1107_v28 = vmul.f32 %v1636_v13, %v1105_v26 }
0x15a6   :  { %1109 = vrot.lane.b32.xlu0 %v1107_v28, %s1675_s12 }
0x15a7   :  { %v1117_v29 = vpop.permute.xlu1 %1116 }
0x15a8   :  { %1119 = vst.msk [vmem:[#allocation3] sm:$0x3] %vm41_vm0, %v1117_v29 }
0x1618   :  { %v1110_v30 = vpop.permute.xlu0 %1109 }
0x1619   :  { %1113 = vst.msk [vmem:[#allocation5 + $0xe] sm:$0x3] %vm41_vm0, %v1110_v30  ;;  %1114 = vst.msk [vmem:[#allocation2] sm:$0x3] %vm41_vm0, %v1110_v30 }
0x1620   :  { %v1127_v3 = vld [vmem:[#allocation5 + $0xe] sm:$0x3] }
0x1621   :  { %v1165_v33 = vcombine.low %v1126_v4, %v1127_v3 }
0x1623   :  { %v1179_v35 = vrot.slane %v1165_v33, %v1740_v10 }
0x1625   :  { %v1180_v36 = vcombine.low %v1172_v34, %v1179_v35 }
0x1627   :  { %1503 = vmatmul.mubr.msk.f32.vlgmr.msra.gmra.mrb[8].mxu1 %vm242_vm3, %v1180_v36 }
0x16fa   :  { %v1504_v38 = vpop.f32.mrb[8].mxu1 }
0x16fb   :  { %v1257_v39 = vadd.f32 %v1504_v38, %v1342_v37  ;;  %v1251_v40 = vpop.f32.mrb[9].mxu1 }
0x16fc   :  { %v1252_v41 = vadd.f32 %v1342_v37, %v1251_v40 }
0x16fd   :  { %1639 = vtanh.f32 %v1257_v39 }
0x16fe   :  { %1641 = vtanh.f32 %v1252_v41 }
0x1707   :  { %v1640_v42 = vpop.eup %1639 }
0x1708   :  { %v1642_v43 = vpop.eup %1641  ;;  %v1281_v44 = vcombine.high %v1640_v42, %v1640_v42  ;;  %v1288_v45 = vrot.slane %v1640_v42, %v1740_v10  ;;  %1347 = vst.sshfl [vmem:[%s1929_s6 + $0x8] sm:$0x3 pattern:$0x76325410] %v1640_v42 }
0x1709   :  { %v1264_v46 = vcombine.high %v1642_v43, %v1642_v43  ;;  %v1271_v47 = vrot.slane %v1642_v43, %v1740_v10  ;;  %1345 = vst.sshfl [vmem:[%s1929_s6] sm:$0x3 pattern:$0x76325410] %v1642_v43 }
0x170a   :  { %v1295_v48 = vrot.slane %v1281_v44, %v1740_v10  ;;  %v1296_v49 = vcombine.high %v1288_v45, %v1288_v45  ;;  %1348 = vst.sshfl [vmem:[%s1929_s6 + $0xc] sm:$0x3 pattern:$0x76325410] %v1281_v44 }
0x170b   :  { %v1278_v50 = vrot.slane %v1264_v46, %v1740_v10  ;;  %v1279_v51 = vcombine.high %v1271_v47, %v1271_v47  ;;  %1346 = vst.sshfl [vmem:[%s1929_s6 + $0x4] sm:$0x3 pattern:$0x76325410] %v1264_v46 }
0x170c   :  { %v1297_v52 = vcombine.high %v1295_v48, %v1295_v48  ;;  %1311 = vst [vmem:[%s1929_s6 + $0xa] sm:$0x3] %v1296_v49 }
0x170d   :  { %v1280_v53 = vcombine.high %v1278_v50, %v1278_v50  ;;  %1307 = vst [vmem:[%s1929_s6 + $0x2] sm:$0x3] %v1279_v51 }
0x170e   :  { %1313 = vst [vmem:[%s1929_s6 + $0xe] sm:$0x3] %v1297_v52 }
0x170f   :  { %1309 = vst [vmem:[%s1929_s6 + $0x6] sm:$0x3] %v1280_v53 }
0x1710   :  { %1318 = vsyncpa [#allocation7], 1 }

</bundles_post_ra>
